<compile_context>
chip_gen: v7x
topology: tpu7x:2x2x1
jax: 0.10.0
libtpu: 0.0.40
codegen_flags: <defaults>
</compile_context>

<pallas_src>
import jax
import jax.numpy as jnp
from jax.experimental import pallas as pl
from jax.experimental.pallas import tpu as pltpu

INSTR_VOCAB = 100
INSTR_DIM = 64
STYLE_VOCAB = 50
STYLE_DIM = 128
SCALAR_DIM = 64                                   # tempo / pitch / duration width
IS_DIM = INSTR_DIM + STYLE_DIM                    # 192: instrument+style contraction
COMBINED_DIM = IS_DIM + 3 * SCALAR_DIM            # 384: full concat width (PyTorch order)
K_FOLDED = IS_DIM + 4                             # 196: [inst|style|tempo|pitch|dur|1]


def _round_up(x, m):
    return (x + m - 1) // m * m


def _choose_h_tiling(h, max_th=2048):
    """Pad H to a multiple of 128 and pick a 128-multiple tile dividing it.

    If H_pad >= 256, guarantee at least two H tiles so a 'parallel' grid axis
    can be sharded across both v7x TensorCores (near-free elsewhere).
    """
    h_pad = _round_up(max(h, 1), 128)
    th = max(min(max_th, h_pad) // 128 * 128, 128)
    while h_pad % th != 0:
        th -= 128
    if h_pad >= 256 and h_pad // th < 2:
        th = max((h_pad // 2) // 128 * 128, 128)
        while h_pad % th != 0:
            th -= 128
    return h_pad, th


def _choose_b_tiling(b, max_tb=256):
    """Pad B to a multiple of 8 sublanes and pick an 8-multiple tile dividing it."""
    b_pad = _round_up(max(b, 1), 8)
    tb = min(_round_up(max_tb, 8), b_pad)
    while b_pad % tb != 0:
        tb -= 8
    return b_pad, tb


# ----------------------------------------------------------------------------
# Kernel: one (TB, 196) x (196, TH) MXU matmul per grid step, f32 accumulate.
# ----------------------------------------------------------------------------
def encoder_kernel(acts_ref, w_ref, out_ref):
    out_ref[...] = jnp.dot(
        acts_ref[...], w_ref[...], preferred_element_type=jnp.float32
    ).astype(out_ref.dtype)


# ----------------------------------------------------------------------------
# Parameter init (mirrors the PyTorch module; Linear weights stored transposed
# as (in, out)).
# ----------------------------------------------------------------------------
def init_params(key, hidden_size):
    ks = jax.random.split(key, 10)
    return {
        "instrument_table": jax.random.normal(ks[0], (INSTR_VOCAB, INSTR_DIM), jnp.float32) * 0.02,
        "style_table": jax.random.normal(ks[1], (STYLE_VOCAB, STYLE_DIM), jnp.float32) * 0.02,
        "w_tempo": jax.random.normal(ks[2], (1, SCALAR_DIM), jnp.float32) * 0.1,
        "b_tempo": jax.random.normal(ks[3], (1, SCALAR_DIM), jnp.float32) * 0.1,
        "w_pitch": jax.random.normal(ks[4], (1, SCALAR_DIM), jnp.float32) * 0.1,
        "b_pitch": jax.random.normal(ks[5], (1, SCALAR_DIM), jnp.float32) * 0.1,
        "w_dur": jax.random.normal(ks[6], (1, SCALAR_DIM), jnp.float32) * 0.1,
        "b_dur": jax.random.normal(ks[7], (1, SCALAR_DIM), jnp.float32) * 0.1,
        "w_proj": jax.random.normal(ks[8], (COMBINED_DIM, hidden_size), jnp.float32) * 0.05,
        "b_proj": jax.random.normal(ks[9], (1, hidden_size), jnp.float32) * 0.05,
    }


def prepare_projection(params, h_pad, weight_dtype):
    """Fold the whole module into one (196, H_pad) projection weight.

    Rows 0:192   : w_proj rows hit by [instrument_emb | style_emb]
    Row  192/3/4 : w_tempo/w_pitch/w_dur @ w_proj[192:256 / 256:320 / 320:384]
    Row  195     : b_proj + b_tempo/b_pitch/b_dur pushed through w_proj
    Row offsets depend on the PyTorch concat order (instrument, style, tempo,
    pitch, duration) — asserted via w_proj's contraction width.
    """
    wp = params["w_proj"]
    assert wp.shape[0] == COMBINED_DIM, f"w_proj must have {COMBINED_DIM} input rows"
    h = wp.shape[1]
    v_t = params["w_tempo"] @ wp[192:256, :]                   # (1, H)
    v_p = params["w_pitch"] @ wp[256:320, :]
    v_d = params["w_dur"] @ wp[320:384, :]
    b_eff = (params["b_proj"]
             + params["b_tempo"] @ wp[192:256, :]
             + params["b_pitch"] @ wp[256:320, :]
             + params["b_dur"] @ wp[320:384, :])               # (1, H)
    w_folded = jnp.concatenate([wp[:IS_DIM, :], v_t, v_p, v_d, b_eff], axis=0)  # (196, H)
    w_folded = jnp.pad(w_folded, ((0, 0), (0, h_pad - h)))
    return w_folded.astype(weight_dtype)


# ----------------------------------------------------------------------------
# Forward wrapper.
# ----------------------------------------------------------------------------
def musical_attributes_encoder(params, instruments, style, tempo, pitch, duration,
                               *, block_h=2048, block_b=256,
                               weight_dtype=jnp.bfloat16, out_dtype=jnp.float32):
    """instruments: int32 (B, N) or (B,); style: int32 (B,);
    tempo/pitch/duration: float32 (B, 1). Returns out_dtype (B, hidden)."""
    # ---- plain-JAX glue: embedding gathers (data-dependent indexing) ----
    inst_emb = params["instrument_table"][instruments]          # (B, N, 64) or (B, 64)
    if inst_emb.ndim > 2:
        inst_emb = inst_emb.sum(axis=1)                         # matches torch .sum(dim=1)
    style_emb = params["style_table"][style]                    # (B, 128)

    b = inst_emb.shape[0]
    h = params["w_proj"].shape[1]
    ones = jnp.ones((b, 1), jnp.float32)
    # Activation cast hoisted out of the kernel (done once, not per grid step).
    acts = jnp.concatenate(
        [inst_emb.astype(jnp.float32), style_emb.astype(jnp.float32),
         tempo.astype(jnp.float32), pitch.astype(jnp.float32),
         duration.astype(jnp.float32), ones],
        axis=1).astype(weight_dtype)                            # (B, 196)

    h_pad, th = _choose_h_tiling(h, block_h)                    # lane-dense output tiles
    b_pad, tb = _choose_b_tiling(b, block_b)                    # sublane-aligned batch tiles

    w_folded = prepare_projection(params, h_pad, weight_dtype)  # (196, h_pad)
    acts_p = jnp.pad(acts, ((0, b_pad - b), (0, 0)))            # (b_pad, 196)

    w_item = jnp.dtype(weight_dtype).itemsize
    cost = pl.CostEstimate(
        flops=2 * b_pad * K_FOLDED * h_pad,
        transcendentals=0,
        bytes_accessed=(K_FOLDED * h_pad + b_pad * K_FOLDED) * w_item
                       + b_pad * h_pad * jnp.dtype(out_dtype).itemsize,
    )

    # Grid order (H, B) with B innermost: each weight tile is DMA'd exactly
    # once; the small activation tile is what gets re-fetched.
    grid = (h_pad // th, b_pad // tb)
    out = pl.pallas_call(
        encoder_kernel,
        out_shape=jax.ShapeDtypeStruct((b_pad, h_pad), out_dtype),
        grid=grid,
        in_specs=[
            pl.BlockSpec((tb, K_FOLDED), lambda hh, bb: (bb, 0)),   # activations
            pl.BlockSpec((K_FOLDED, th), lambda hh, bb: (0, hh)),   # folded weight (streamed)
        ],
        out_specs=pl.BlockSpec((tb, th), lambda hh, bb: (bb, hh)),
        compiler_params=pltpu.CompilerParams(
            dimension_semantics=("parallel", "parallel"),           # megacore on v7x
        ),
        cost_estimate=cost,
    )(acts_p, w_folded)

    return out[:b, :h]


# ----------------------------------------------------------------------------
# Pure-JAX reference mirroring the PyTorch forward (f32 throughout).
# ----------------------------------------------------------------------------
def reference_forward(params, instruments, style, tempo, pitch, duration):
    inst_emb = params["instrument_table"][instruments]
    if inst_emb.ndim > 2:
        inst_emb = inst_emb.sum(axis=1)
    style_emb = params["style_table"][style]
    tempo_emb = tempo @ params["w_tempo"] + params["b_tempo"]
    pitch_emb = pitch @ params["w_pitch"] + params["b_pitch"]
    dur_emb = duration @ params["w_dur"] + params["b_dur"]
    combined = jnp.concatenate(
        [inst_emb, style_emb, tempo_emb, pitch_emb, dur_emb], axis=1)
    return combined @ params["w_proj"] + params["b_proj"]


if __name__ == "__main__":
    key = jax.random.PRNGKey(0)
    k_param, k_inst, k_style, k_tempo, k_pitch, k_dur = jax.random.split(key, 6)

    B = 2            # batch
    N_INST = 3       # instruments per example
    HIDDEN = 32      # config.hidden_size

    params = init_params(k_param, HIDDEN)

    instruments = jax.random.randint(k_inst, (B, N_INST), 0, INSTR_VOCAB, jnp.int32)
    style = jax.random.randint(k_style, (B,), 0, STYLE_VOCAB, jnp.int32)
    tempo = jax.random.uniform(k_tempo, (B, 1), jnp.float32, 60.0, 180.0)
    pitch = jax.random.uniform(k_pitch, (B, 1), jnp.float32, 0.0, 1.0)
    duration = jax.random.uniform(k_dur, (B, 1), jnp.float32, 1.0, 30.0)

    ref = reference_forward(params, instruments, style, tempo, pitch, duration)

    # 1) Bit-exact semantics check with an f32 weight stream.
    out_f32 = musical_attributes_encoder(
        params, instruments, style, tempo, pitch, duration, weight_dtype=jnp.float32)
    out_f32 = jax.block_until_ready(out_f32)
    assert out_f32.shape == (B, HIDDEN), out_f32.shape
    assert jnp.allclose(out_f32, ref, atol=1e-4, rtol=1e-4), "f32 path mismatch vs reference"

    # 2) Default (bf16 weight stream, f32 accumulate) — quantization-level tolerance.
    out_bf16 = musical_attributes_encoder(
        params, instruments, style, tempo, pitch, duration)
    out_bf16 = jax.block_until_ready(out_bf16)
    assert out_bf16.shape == (B, HIDDEN), out_bf16.shape
    rel_err = jnp.max(jnp.abs(out_bf16 - ref)) / jnp.maximum(jnp.max(jnp.abs(ref)), 1.0)
    assert rel_err < 5e-2, f"bf16 path rel err too large: {rel_err}"

    print("KERNEL_OK")
</pallas_src>

<mosaic_0001>
module attributes {stable_mosaic.version = 11 : i64} {
  func.func @encoder_kernel(%arg0: i32, %arg1: i32, %arg2: memref<8x196xf32, #tpu.memory_space<vmem>>, %arg3: memref<196x128xf32, #tpu.memory_space<vmem>>, %arg4: memref<8x128xf32, #tpu.memory_space<vmem>>) attributes {dimension_semantics = [#tpu.dimension_semantics<parallel>, #tpu.dimension_semantics<parallel>], iteration_bounds = array<i64: 1, 1>, scalar_prefetch = 0 : i64, scratch_operands = 0 : i64, tpu.core_type = #tpu.core_type<tc>, window_params = [{transform_indices = @transform_0, window_bounds = array<i64: 8, 196>}, {transform_indices = @transform_1, window_bounds = array<i64: 196, 128>}, {transform_indices = @transform_2, window_bounds = array<i64: 8, 128>}]} {
    %c0 = arith.constant 0 : index
    %c0_0 = arith.constant 0 : index
    %0 = vector.load %arg2[%c0, %c0_0] : memref<8x196xf32, #tpu.memory_space<vmem>>, vector<8x196xf32>
    %c0_1 = arith.constant 0 : index
    %c0_2 = arith.constant 0 : index
    %1 = vector.load %arg3[%c0_1, %c0_2] : memref<196x128xf32, #tpu.memory_space<vmem>>, vector<196x128xf32>
    %cst = arith.constant dense<0.000000e+00> : vector<8x128xf32>
    %2 = tpu.matmul %0, %1, %cst {dimension_numbers = #tpu.dot_dimension_numbers<[1], [0], [0], [1], [0, 0, 1, 1], [], []>} : vector<8x196xf32>, vector<196x128xf32>, vector<8x128xf32> -> vector<8x128xf32>
    %c0_3 = arith.constant 0 : index
    %c0_4 = arith.constant 0 : index
    %3 = vector.load %arg4[%c0_3, %c0_4] : memref<8x128xf32, #tpu.memory_space<vmem>>, vector<8x128xf32>
    tpu.vector_store %arg4[%c0_3, %c0_4], %2 {strides = array<i32>} : memref<8x128xf32, #tpu.memory_space<vmem>>, vector<8x128xf32>,
    return
  }
  func.func @transform_0(%arg0: i32, %arg1: i32) -> (i32, i32) {
    %c0_i32 = arith.constant 0 : i32
    %c0_i32_0 = arith.constant 0 : i32
    return %arg1, %c0_i32 : i32, i32
  }
  func.func @transform_1(%arg0: i32, %arg1: i32) -> (i32, i32) {
    %c0_i32 = arith.constant 0 : i32
    %c0_i32_0 = arith.constant 0 : i32
    return %c0_i32, %arg0 : i32, i32
  }
  func.func @transform_2(%arg0: i32, %arg1: i32) -> (i32, i32) {
    %c0_i32 = arith.constant 0 : i32
    return %arg1, %arg0 : i32, i32
  }
}

</mosaic_0001>

<bundles_post_ra>
// kernel: tpu_custom_call.1
= control target key start
LH: loop header
LB: loop body
LE: loop exit
PB: predicated region body
PF: predicated region fallthrough
CT: control target
= control target key end

     0   :  { %7 = vsyncpa [#allocation3], 0  ;;  %s342_s0 = inlined_call_operand.hbm [shape: f32[8,196], index: 0, kind: input, shape index: {}]   ;;  %s343_s1 = inlined_call_operand.hbm [shape: f32[196,128], index: 1, kind: input, shape index: {}]   ;;  %s344_s2 = inlined_call_operand.hbm [shape: f32[8,128], index: 2, kind: output, shape index: {}]  }
   0x1   :  { %8 = vsyncpa [#allocation6], 0 }
   0x2   :  { %9 = vsyncpa [#allocation4], 0  ;;  %s277_s9 = smov [#allocation2]   ;;  %s278_s11 = smov [#allocation5]  }
   0x3   :  { %s16_s10 = sshll.u32 %s277_s9, 4  ;;  %s25_s12 = sshll.u32 %s278_s11, 4  ;;  %s17_s10 = int_to_ptr.vmem [resolvable:$true] %s16_s10  ;;  %s299_s12 = int_to_ptr.vmem [resolvable:$true] %s25_s12 }
   0x4   :  { %s205_s15 = scalar_lea.hbm %s342_s0, 256 }
   0x5   :  { %p206_p0 = scmp.ne.s32.totalorder %s342_s0, %s205_s15  ;;  %p209_p1 = scmp.lt.u32.totalorder %s205_s15, %s342_s0 }
   0x7   :  { %p211_p2 = pnand %p209_p1, %p206_p0 }
   0x9   :  { %214 = shalt.err (!%p211_p2)
}
   0xa   :  { %s215_s20 = scalar_lea.vmem %s17_s10, 256  ;;  %p220_p4 = scmp.lt.s32.totalorder %s17_s10, %s17_s10 }
   0xb   :  { %p216_p3 = scmp.ne.s32.totalorder %s17_s10, %s215_s20  ;;  %p221_p5 = scmp.lt.s32.totalorder %s215_s20, %s215_s20 }
   0xd   :  { %p222_p6 = por %p221_p5, %p220_p4 }
   0xf   :  { %p223_p7 = pnand %p222_p6, %p216_p3 }
  0x11   :  { %226 = shalt.err (!%p223_p7)
}
  0x12   :  { %19 = dma.hbm_to_vmem [thread:$0]  %s342_s0, 256, %s17_s10, [#allocation3]  }
  0x13   :  { %s227_s25 = scalar_lea.hbm %s343_s1, 3200 }
  0x14   :  { %p228_p8 = scmp.ne.s32.totalorder %s343_s1, %s227_s25  ;;  %p231_p9 = scmp.lt.u32.totalorder %s227_s25, %s343_s1 }
  0x16   :  { %p233_p10 = pnand %p231_p9, %p228_p8 }
  0x18   :  { %236 = shalt.err (!%p233_p10)
}
  0x19   :  { %s237_s30 = scalar_lea.vmem %s299_s12, 3200  ;;  %p242_p12 = scmp.lt.s32.totalorder %s299_s12, %s299_s12 }
  0x1a   :  { %p238_p11 = scmp.ne.s32.totalorder %s299_s12, %s237_s30  ;;  %p243_p13 = scmp.lt.s32.totalorder %s237_s30, %s237_s30 }
  0x1c   :  { %p244_p0 = por %p243_p13, %p242_p12 }
  0x1e   :  { %p245_p1 = pnand %p244_p0, %p238_p11 }
  0x20   :  { %248 = shalt.err (!%p245_p1)
}
  0x21   :  { %s279_s0 = smov 128   ;;  %s280_s3 = smov 8  }
  0x22   :  { %31 = dma.hbm_to_vmem [thread:$0]  %s343_s1, 3200, %s299_s12, [#allocation6], %s279_s0, %s279_s0, %s280_s3  }
  0x23   :  { %271 = dma.done.wait [#allocation3], 256  }
  0x24   :  { %272 = vsyncadd [#allocation3], 4294967040 }
  0x25   :  { %273 = dma.done.wait [#allocation6], 3200  }
  0x26   :  { %274 = vsyncadd [#allocation6], 4294964096  ;;  %v281_v0 = vmov 0.0|0.0   ;;  %v40_v1 = vld [vmem:[#allocation5] sm:$0xff]  ;;  %v41_v2 = vld [vmem:[#allocation5 + $0x8] sm:$0xff]  ;;  %vm65_vm0 = vcmask 556032  }
  0x27   :  { %162 = vmatprep.subr.bf16.mxu0 %v281_v0  ;;  %v42_v3 = vld [vmem:[#allocation5 + $0x10] sm:$0xff]  ;;  %v163_v4 = vpack.c.bf16 %v41_v2, %v40_v1  ;;  %v43_v5 = vld [vmem:[#allocation5 + $0x18] sm:$0xff]  ;;  %v44_v7 = vld [vmem:[#allocation5 + $0x20] sm:$0xff]  ;;  %v282_v38 = vmov 0.0   ;;  %vm69_vm1 = vcmask 1043456   ;;  %s283_s1 = smov [#allocation7]  }
  0x28   :  { %v166_v6 = vpack.c.bf16 %v43_v5, %v42_v3  ;;  %v45_v8 = vld [vmem:[#allocation5 + $0x28] sm:$0xff]  ;;  %v46_v10 = vld [vmem:[#allocation5 + $0x30] sm:$0xff]  ;;  %v47_v11 = vld [vmem:[#allocation5 + $0x38] sm:$0xff]  ;;  %s150_s6 = sshll.u32 %s283_s1, 4  ;;  %s151_s6 = int_to_ptr.vmem [resolvable:$true] %s150_s6 }
  0x29   :  { %164 = vmatpush1.bf16.msra.mxu0 %v163_v4  ;;  %v169_v9 = vpack.c.bf16 %v45_v8, %v44_v7  ;;  %v39_v12 = vld [vmem:[#allocation2 + $0x8] sm:$0xff]  ;;  %v172_v13 = vpack.c.bf16 %v47_v11, %v46_v10  ;;  %v48_v14 = vld [vmem:[#allocation5 + $0x40] sm:$0xff]  ;;  %v49_v15 = vld [vmem:[#allocation5 + $0x48] sm:$0xff]  ;;  %s249_s7 = scalar_lea.vmem %s151_s6, 128  ;;  %p254_p3 = scmp.lt.s32.totalorder %s151_s6, %s151_s6 }
  0x2a   :  { %165 = vmatprep.subr.bf16.mxu0 %v281_v0  ;;  %161 = vmatprep.mubr.msk.f32.mxu0 %vm65_vm0, %v39_v12  ;;  %v175_v16 = vpack.c.bf16 %v49_v15, %v48_v14  ;;  %v50_v17 = vld [vmem:[#allocation5 + $0x50] sm:$0xff]  ;;  %v51_v18 = vld [vmem:[#allocation5 + $0x58] sm:$0xff]  ;;  %v52_v20 = vld [vmem:[#allocation5 + $0x60] sm:$0xff]  ;;  %p250_p2 = scmp.ne.s32.totalorder %s151_s6, %s249_s7  ;;  %p255_p4 = scmp.lt.s32.totalorder %s249_s7, %s249_s7 }
  0x2b   :  { %v178_v19 = vpack.c.bf16 %v51_v18, %v50_v17  ;;  %v53_v21 = vld [vmem:[#allocation5 + $0x68] sm:$0xff]  ;;  %v54_v23 = vld [vmem:[#allocation5 + $0x70] sm:$0xff]  ;;  %v55_v24 = vld [vmem:[#allocation5 + $0x78] sm:$0xff] }
  0x2c   :  { %v181_v22 = vpack.c.bf16 %v53_v21, %v52_v20  ;;  %v184_v25 = vpack.c.bf16 %v55_v24, %v54_v23  ;;  %v56_v26 = vld [vmem:[#allocation5 + $0x80] sm:$0xff]  ;;  %v57_v27 = vld [vmem:[#allocation5 + $0x88] sm:$0xff]  ;;  %v58_v29 = vld [vmem:[#allocation5 + $0x90] sm:$0xff]  ;;  %p256_p5 = por %p255_p4, %p254_p3 }
  0x2d   :  { %167 = vmatpush1.bf16.msra.mxu0 %v166_v6  ;;  %v187_v28 = vpack.c.bf16 %v57_v27, %v56_v26  ;;  %v59_v30 = vld [vmem:[#allocation5 + $0x98] sm:$0xff]  ;;  %v60_v32 = vld [vmem:[#allocation5 + $0xa0] sm:$0xff]  ;;  %v61_v33 = vld [vmem:[#allocation5 + $0xa8] sm:$0xff] }
  0x2e   :  { %168 = vmatprep.subr.bf16.mxu0 %v281_v0  ;;  %v190_v31 = vpack.c.bf16 %v59_v30, %v58_v29  ;;  %v193_v34 = vpack.c.bf16 %v61_v33, %v60_v32  ;;  %v62_v35 = vld [vmem:[#allocation5 + $0xb0] sm:$0xff]  ;;  %v63_v36 = vld [vmem:[#allocation5 + $0xb8] sm:$0xff]  ;;  %v64_v39 = vld [vmem:[#allocation5 + $0xc0] sm:$0xf]  ;;  %p257_p6 = pnand %p256_p5, %p250_p2 }
  0x2f   :  { %v196_v37 = vpack.c.bf16 %v63_v36, %v62_v35  ;;  %v38_v40 = vld [vmem:[#allocation2] sm:$0xff] }
  0x31   :  { %170 = vmatpush1.bf16.msra.mxu0 %v169_v9 }
  0x32   :  { %171 = vmatprep.subr.bf16.mxu0 %v281_v0 }
  0x35   :  { %173 = vmatpush1.bf16.msra.mxu0 %v172_v13 }
  0x36   :  { %174 = vmatprep.subr.bf16.mxu0 %v281_v0 }
  0x39   :  { %176 = vmatpush1.bf16.msra.mxu0 %v175_v16 }
  0x3a   :  { %177 = vmatprep.subr.bf16.mxu0 %v281_v0 }
  0x3d   :  { %179 = vmatpush1.bf16.msra.mxu0 %v178_v19 }
  0x3e   :  { %180 = vmatprep.subr.bf16.mxu0 %v281_v0 }
  0x41   :  { %182 = vmatpush1.bf16.msra.mxu0 %v181_v22 }
  0x42   :  { %183 = vmatprep.subr.bf16.mxu0 %v281_v0 }
  0x45   :  { %185 = vmatpush1.bf16.msra.mxu0 %v184_v25 }
  0x46   :  { %186 = vmatprep.subr.bf16.mxu0 %v281_v0 }
  0x49   :  { %188 = vmatpush1.bf16.msra.mxu0 %v187_v28 }
  0x4a   :  { %189 = vmatprep.subr.bf16.mxu0 %v281_v0 }
  0x4d   :  { %191 = vmatpush1.bf16.msra.mxu0 %v190_v31 }
  0x4e   :  { %192 = vmatprep.subr.bf16.mxu0 %v281_v0 }
  0x51   :  { %194 = vmatpush1.bf16.msra.mxu0 %v193_v34 }
  0x52   :  { %195 = vmatprep.subr.bf16.mxu0 %v281_v0 }
  0x55   :  { %197 = vmatpush1.bf16.msra.mxu0 %v196_v37 }
  0x56   :  { %121 = vmatprep.subr.mxu0 %v282_v38 }
  0x59   :  { %160 = vmatpush1.msk.msra.mxu0 %vm69_vm1, %v64_v39 }
  0x5a   :  { %138 = vmatmul.mubr.f32.vlgmr.msra.gmra.mrb[0].mxu0 %v38_v40 }
 0x12d   :  { %v139_v41 = vpop.f32.mrb[0].mxu0 }
 0x12e   :  { %143 = vst [vmem:[#allocation7] sm:$0xff] %v139_v41  ;;  %v141_v42 = vpop.f32.mrb[1].mxu0 }
 0x12f   :  { %260 = shalt.err (!%p257_p6)
}
 0x130   :  { %s261_s10 = scalar_lea.hbm %s344_s2, 128 }
 0x131   :  { %p262_p7 = scmp.ne.s32.totalorder %s344_s2, %s261_s10  ;;  %p265_p8 = scmp.lt.u32.totalorder %s261_s10, %s344_s2 }
 0x133   :  { %p267_p9 = pnand %p265_p8, %p262_p7 }
 0x135   :  { %270 = shalt.err (!%p267_p9)
}
 0x136   :  { %153 = dma.vmem_to_hbm [thread:$0]  %s151_s6, 128, %s344_s2, [#allocation4]  }
 0x137   :  { %275 = dma.done.wait [#allocation4], 128  }
 0x138   :  { %276 = vsyncadd [#allocation4], 4294967168 }
 0x139   :  { %157 = vsyncpa [#allocation3], 1 }
 0x13a   :  { %158 = vsyncpa [#allocation6], 1 }
 0x13b   :  { %159 = vsyncpa [#allocation4], 1 }

</bundles_post_ra>
